<compile_context>
chip_gen: v7x
topology: tpu7x:2x2x1
jax: 0.10.0
libtpu: 0.0.40
codegen_flags: <defaults>
</compile_context>

<pallas_src>
from functools import partial

import jax
import jax.numpy as jnp
from jax import lax
from jax.experimental import pallas as pl
from jax.experimental.pallas import tpu as pltpu

LANES = 128
SUBLANES = 8


# -----------------------------------------------------------------------------
# Pallas kernel: im2col-matmul Conv1d + ReLU + MaxPool1d(L) + Linear + Softmax
# -----------------------------------------------------------------------------
def approximator_kernel(slab_ref,    # (B_pad*L, 128) f32: im2col cols [0,K*D), ones col K*D, zero pad
                        wconv_ref,   # (128, H+1) f32: conv taps; row K*D = [bconv | 1]; rest 0
                        wlin_ref,    # (H+1, 128) f32: rows [0,H) = wlin^T, row H = blin; lanes >= C are 0
                        o_ref,       # (B_pad, 128) f32 softmax probs (lanes >= C are 0)
                        *, L, C):
    n_rows = slab_ref.shape[0]
    b_pad = n_rows // L

    # Conv1d('same', stride=1) + bias as ONE lane-padded MXU matmul.  The
    # trailing ones column of the slab both injects the conv bias (row K*D of
    # wconv_ref) and produces a constant-1 channel (column H) that survives
    # ReLU and max-pool to carry the Linear bias through the second matmul.
    conv = jnp.dot(slab_ref[...], wconv_ref[...],
                   preferred_element_type=jnp.float32)          # (n_rows, H+1)
    conv = jnp.maximum(conv, 0.0)                               # ReLU

    # MaxPool1d(L): aligned (B_pad, L, H+1) view (L == 8 == sublane tile),
    # single cross-sublane reduce.  Every row is a valid output position
    # (im2col already handled the 'same' zero padding), so no masking needed.
    g = jnp.max(conv.reshape(b_pad, L, conv.shape[-1]), axis=1)  # (B_pad, H+1)

    # Linear (+bias via the carried 1-channel) straight into a lane-dense tile.
    logits = jnp.dot(g, wlin_ref[...],
                     preferred_element_type=jnp.float32)         # (B_pad, 128)

    # Softmax over the C valid lanes only (pad lanes masked to a large negative).
    lane = lax.broadcasted_iota(jnp.int32, logits.shape, 1)
    logits = jnp.where(lane < C, logits, -1e30)
    m = jnp.max(logits, axis=-1, keepdims=True)
    ex = jnp.exp(logits - m)
    o_ref[...] = ex / jnp.sum(ex, axis=-1, keepdims=True)


# -----------------------------------------------------------------------------
# One-time weight re-layout (hoisted out of the per-call path)
# -----------------------------------------------------------------------------
def pack_params(params):
    wconv = params["wconv"]                      # (H, D, K)  nn.Conv1d layout
    H, D, K = wconv.shape
    C = params["wlin"].shape[0]
    KD = K * D
    assert KD + 1 <= LANES, "K*D must fit in one 128-lane slab"
    assert C <= LANES

    # Conv weight, tap-major, lane-padded to 128 rows; bias + passthrough row.
    w1 = jnp.zeros((LANES, H + 1), jnp.float32)
    w1 = w1.at[:KD, :H].set(jnp.transpose(wconv, (2, 1, 0)).reshape(KD, H))
    w1 = w1.at[KD, :H].set(params["bconv"])
    w1 = w1.at[KD, H].set(1.0)

    # Linear weight transposed + bias row, output lanes padded to 128.
    w2 = jnp.zeros((H + 1, LANES), jnp.float32)
    w2 = w2.at[:H, :C].set(params["wlin"].T)
    w2 = w2.at[H, :C].set(params["blin"])

    packed = {"emb": params["emb"].astype(jnp.float32),
              "wconv_aug": w1, "wlin_aug": w2}
    dims = dict(K=K, H=H, D=D, C=C)
    return packed, dims


# -----------------------------------------------------------------------------
# Forward wrapper
# -----------------------------------------------------------------------------
@partial(jax.jit, static_argnames=("K", "C"))
def approximator_forward(x_tokens, z, emb, wconv_aug, wlin_aug, *, K, C):
    B, L = x_tokens.shape
    D = emb.shape[1]
    KD = K * D
    B_pad = ((B + SUBLANES - 1) // SUBLANES) * SUBLANES   # sublane-aligned rows

    # Embedding gather + selection-mask multiply (one fused XLA glue op).
    # TODO(synk): fuse this gather into the kernel (scalar-prefetched token ids
    #             + DMA gather from an HBM-resident table) once B/L grow enough
    #             for the extra HBM round trip of the slab to matter.
    e = jnp.take(emb, x_tokens, axis=0) * z                          # (B, L, D)

    # im2col for Conv1d(padding='same', stride=1); append the ones column that
    # carries both biases; lane-pad to 128; sublane-pad batch rows to B_pad.
    pad_l = (K - 1) // 2
    pad_r = (K - 1) - pad_l
    e_pad = jnp.pad(e, ((0, 0), (pad_l, pad_r), (0, 0)))             # (B, L+K-1, D)
    taps = jnp.stack([e_pad[:, k:k + L, :] for k in range(K)], axis=2)
    im2col = taps.reshape(B * L, KD)
    slab = jnp.concatenate(
        [im2col,
         jnp.ones((B * L, 1), jnp.float32),
         jnp.zeros((B * L, LANES - KD - 1), jnp.float32)], axis=1)   # (B*L, 128)
    slab = jnp.pad(slab, ((0, (B_pad - B) * L), (0, 0)))             # (B_pad*L, 128)

    vmem = pl.BlockSpec(memory_space=pltpu.MemorySpace.VMEM)
    out = pl.pallas_call(
        partial(approximator_kernel, L=L, C=C),
        out_shape=jax.ShapeDtypeStruct((B_pad, LANES), jnp.float32),
        in_specs=[vmem, vmem, vmem],
        out_specs=vmem,
    )(slab, wconv_aug, wlin_aug)
    return out[:B, :C]


# -----------------------------------------------------------------------------
# Pure-JAX reference (for correctness check)
# -----------------------------------------------------------------------------
def approximator_reference(x_tokens, z, params):
    e = jnp.take(params["emb"], x_tokens, axis=0).astype(jnp.float32) * z  # (B,L,D)
    e = jnp.swapaxes(e, 1, 2)                                              # (B,D,L)
    wconv = params["wconv"]                                                # (H,D,K)
    K = wconv.shape[-1]
    pad_l = (K - 1) // 2
    pad_r = (K - 1) - pad_l
    conv = lax.conv_general_dilated(
        e, wconv, window_strides=(1,), padding=[(pad_l, pad_r)],
        dimension_numbers=("NCH", "OIH", "NCH"))                           # (B,H,L)
    conv = jax.nn.relu(conv + params["bconv"][None, :, None])
    g = jnp.max(conv, axis=-1)                                             # (B,H)
    logits = g @ params["wlin"].T + params["blin"]
    return jax.nn.softmax(logits, axis=-1)


# -----------------------------------------------------------------------------
# Deterministic parameter init (synthetic; PyTorch-native shapes)
# -----------------------------------------------------------------------------
def init_params(key, V, D, C, H, K):
    ks = jax.random.split(key, 5)
    u = lambda k, shape, s: jax.random.uniform(k, shape, jnp.float32, -s, s)
    s_conv = 1.0 / jnp.sqrt(D * K)
    s_lin = 1.0 / jnp.sqrt(H)
    return {
        "emb":   jax.random.normal(ks[0], (V, D), jnp.float32),
        "wconv": u(ks[1], (H, D, K), s_conv),   # nn.Conv1d weight layout
        "bconv": u(ks[2], (H,), s_conv),
        "wlin":  u(ks[3], (C, H), s_lin),       # nn.Linear weight layout
        "blin":  u(ks[4], (C,), s_lin),
    }


if __name__ == "__main__":
    # V=50 vocab, D=32 embed, L=8 seq, C=4 classes, H=32 hidden,
    # in_kernel=3, p=0.1 (dropout, identity in eval), batch B=2.
    V, D, L, C, H, in_kernel, p_drop = 50, 32, 8, 4, 32, 3, 0.1
    B = 2

    key = jax.random.PRNGKey(0)
    k_param, k_tok, k_z = jax.random.split(key, 3)
    params = init_params(k_param, V, D, C, H, in_kernel)
    x_tokens = jax.random.randint(k_tok, (B, L), 0, V, dtype=jnp.int32)
    z = jax.random.uniform(k_z, (B, L, 1), dtype=jnp.float32)   # selection mask

    packed, dims = pack_params(params)                           # one-time re-layout
    probs = approximator_forward(x_tokens, z, packed["emb"],
                                 packed["wconv_aug"], packed["wlin_aug"],
                                 K=dims["K"], C=dims["C"])
    probs = jax.block_until_ready(probs)

    ref = approximator_reference(x_tokens, z, params)
    assert probs.shape == (B, C)
    err = float(jnp.max(jnp.abs(probs - ref)))
    assert jnp.allclose(probs, ref, atol=1e-4, rtol=1e-4), f"max abs err {err}"
    assert jnp.allclose(jnp.sum(probs, axis=-1), 1.0, atol=1e-4)

    print("KERNEL_OK")
</pallas_src>

<mosaic_0001>
module attributes {stable_mosaic.version = 11 : i64} {
  func.func @approximator_kernel(%arg0: memref<64x128xf32, #tpu.memory_space<vmem>>, %arg1: memref<128x33xf32, #tpu.memory_space<vmem>>, %arg2: memref<33x128xf32, #tpu.memory_space<vmem>>, %arg3: memref<8x128xf32, #tpu.memory_space<vmem>>) attributes {dimension_semantics = [], scalar_prefetch = 0 : i64, scratch_operands = 0 : i64, tpu.core_type = #tpu.core_type<tc>} {
    %c0 = arith.constant 0 : index
    %c0_0 = arith.constant 0 : index
    %0 = vector.load %arg0[%c0, %c0_0] : memref<64x128xf32, #tpu.memory_space<vmem>>, vector<64x128xf32>
    %c0_1 = arith.constant 0 : index
    %c0_2 = arith.constant 0 : index
    %1 = vector.load %arg1[%c0_1, %c0_2] : memref<128x33xf32, #tpu.memory_space<vmem>>, vector<128x33xf32>
    %cst = arith.constant dense<0.000000e+00> : vector<64x33xf32>
    %2 = tpu.matmul %0, %1, %cst {dimension_numbers = #tpu.dot_dimension_numbers<[1], [0], [0], [1], [0, 0, 1, 1], [], []>} : vector<64x128xf32>, vector<128x33xf32>, vector<64x33xf32> -> vector<64x33xf32>
    %cst_3 = arith.constant 0.000000e+00 : f32
    %3 = vector.broadcast %cst_3 : f32 to vector<64x33xf32>
    %4 = arith.maximumf %2, %3 : vector<64x33xf32>
    %5 = vector.shape_cast %4 : vector<64x33xf32> to vector<8x8x33xf32>
    %cst_4 = arith.constant dense<0xFF800000> : vector<8x33xf32>
    %6 = vector.multi_reduction <maximumf>, %5, %cst_4 [1] : vector<8x8x33xf32> to vector<8x33xf32>
    %c0_5 = arith.constant 0 : index
    %c0_6 = arith.constant 0 : index
    %7 = vector.load %arg2[%c0_5, %c0_6] : memref<33x128xf32, #tpu.memory_space<vmem>>, vector<33x128xf32>
    %cst_7 = arith.constant dense<0.000000e+00> : vector<8x128xf32>
    %8 = tpu.matmul %6, %7, %cst_7 {dimension_numbers = #tpu.dot_dimension_numbers<[1], [0], [0], [1], [0, 0, 1, 1], [], []>} : vector<8x33xf32>, vector<33x128xf32>, vector<8x128xf32> -> vector<8x128xf32>
    %9 = tpu.iota {dimensions = array<i32: 1>} : vector<8x128xi32>
    %c4_i32 = arith.constant 4 : i32
    %10 = vector.broadcast %c4_i32 : i32 to vector<8x128xi32>
    %11 = arith.cmpi slt, %9, %10 : vector<8x128xi32>
    %cst_8 = arith.constant -1.000000e+30 : f32
    %12 = vector.broadcast %cst_8 : f32 to vector<8x128xf32>
    %13 = arith.select %11, %8, %12 : vector<8x128xi1>, vector<8x128xf32>
    %cst_9 = arith.constant dense<0xFF800000> : vector<8xf32>
    %14 = vector.multi_reduction <maximumf>, %13, %cst_9 [1] : vector<8x128xf32> to vector<8xf32>
    %15 = vector.shape_cast %14 : vector<8xf32> to vector<8x1xf32>
    %16 = vector.broadcast %15 : vector<8x1xf32> to vector<8x128xf32>
    %17 = arith.subf %13, %16 : vector<8x128xf32>
    %18 = math.exp %17 : vector<8x128xf32>
    %cst_10 = arith.constant dense<0.000000e+00> : vector<8xf32>
    %19 = vector.multi_reduction <add>, %18, %cst_10 [1] : vector<8x128xf32> to vector<8xf32>
    %20 = vector.shape_cast %19 : vector<8xf32> to vector<8x1xf32>
    %21 = vector.broadcast %20 : vector<8x1xf32> to vector<8x128xf32>
    %22 = arith.divf %18, %21 : vector<8x128xf32>
    %c0_11 = arith.constant 0 : index
    %c0_12 = arith.constant 0 : index
    %23 = vector.load %arg3[%c0_11, %c0_12] : memref<8x128xf32, #tpu.memory_space<vmem>>, vector<8x128xf32>
    tpu.vector_store %arg3[%c0_11, %c0_12], %22 {strides = array<i32>} : memref<8x128xf32, #tpu.memory_space<vmem>>, vector<8x128xf32>,
    return
  }
}

</mosaic_0001>

<bundles_post_ra>
// kernel: approximator_forward.1
= control target key start
LH: loop header
LB: loop body
LE: loop exit
PB: predicated region body
PF: predicated region fallthrough
CT: control target
= control target key end

     0   :  { %v463_v35 = vmov 0.0|0.0   ;;  %vm237_vm0 = vcmask 1040384   ;;  %v464_v40 = vmov 0.0   ;;  %vm465_vm1 = vmmov 0   ;;  %s586_s1 = inlined_call_operand.vmem [shape: f32[128,33], index: 1, kind: input, shape index: {}]   ;;  %s587_s0 = inlined_call_operand.vmem [shape: f32[64,128], index: 0, kind: input, shape index: {}]   ;;  %s588_s2 = inlined_call_operand.vmem [shape: f32[33,128], index: 2, kind: input, shape index: {}]   ;;  %s589_s3 = inlined_call_operand.vmem [shape: f32[8,128], index: 3, kind: output, shape index: {}]  }
   0x1   :  { %v22_v0 = vld [vmem:[%s586_s1] sm:$0xff]  ;;  %v23_v1 = vld [vmem:[%s586_s1 + $0x8] sm:$0xff]  ;;  %v24_v2 = vld [vmem:[%s586_s1 + $0x10] sm:$0xff]  ;;  %450 = vmatprep.subr.bf16.mxu1 %v463_v35  ;;  %415 = vmatprep.mubr.msk.f32.mxu1 %vm465_vm1, %v464_v40  ;;  %vm151_vm2 = vcmask 269312   ;;  %vm221_vm3 = vcmask 1041409   ;;  %vm223_vm4 = vcmask 1042434  }
   0x2   :  { %v418_v3 = vpack.c.bf16 %v23_v1, %v22_v0  ;;  %v25_v4 = vld [vmem:[%s586_s1 + $0x18] sm:$0xff]  ;;  %v26_v6 = vld [vmem:[%s586_s1 + $0x20] sm:$0xff]  ;;  %v27_v7 = vld [vmem:[%s586_s1 + $0x28] sm:$0xff]  ;;  %vm225_vm5 = vcmask 1043459   ;;  %vm227_vm6 = vcmask 1044484   ;;  %vm229_vm7 = vcmask 1045509  }
   0x3   :  { %v422_v5 = vpack.c.bf16 %v25_v4, %v24_v2  ;;  %v426_v8 = vpack.c.bf16 %v27_v7, %v26_v6  ;;  %v14_v9 = vld [vmem:[%s587_s0] sm:$0xff]  ;;  %v28_v10 = vld [vmem:[%s586_s1 + $0x30] sm:$0xff]  ;;  %v29_v11 = vld [vmem:[%s586_s1 + $0x38] sm:$0xff]  ;;  %vm231_vm8 = vcmask 1046534   ;;  %vm233_vm9 = vcmask 1047559  }
   0x4   :  { %419 = vmatprep.subr.bf16.mxu0 %v418_v3  ;;  %393 = vmatprep.mubr.f32.mxu0 %v14_v9  ;;  %v430_v12 = vpack.c.bf16 %v29_v11, %v28_v10  ;;  %v30_v13 = vld [vmem:[%s586_s1 + $0x40] sm:$0xff]  ;;  %v31_v14 = vld [vmem:[%s586_s1 + $0x48] sm:$0xff]  ;;  %v32_v16 = vld [vmem:[%s586_s1 + $0x50] sm:$0xff] }
   0x5   :  { %421 = vmatpush3.bf16.msra.mxu0 %v418_v3  ;;  %v434_v15 = vpack.c.bf16 %v31_v14, %v30_v13  ;;  %v33_v17 = vld [vmem:[%s586_s1 + $0x58] sm:$0xff]  ;;  %v34_v19 = vld [vmem:[%s586_s1 + $0x60] sm:$0xff]  ;;  %v35_v20 = vld [vmem:[%s586_s1 + $0x68] sm:$0xff] }
   0x6   :  { %423 = vmatprep.subr.bf16.mxu0 %v422_v5  ;;  %v438_v18 = vpack.c.bf16 %v33_v17, %v32_v16  ;;  %v442_v21 = vpack.c.bf16 %v35_v20, %v34_v19  ;;  %v36_v22 = vld [vmem:[%s586_s1 + $0x70] sm:$0xff]  ;;  %v37_v23 = vld [vmem:[%s586_s1 + $0x78] sm:$0xff]  ;;  %v15_v25 = vld [vmem:[%s587_s0 + $0x8] sm:$0xff] }
   0x7   :  { %v446_v24 = vpack.c.bf16 %v37_v23, %v36_v22  ;;  %v16_v26 = vld [vmem:[%s587_s0 + $0x10] sm:$0xff]  ;;  %v17_v27 = vld [vmem:[%s587_s0 + $0x18] sm:$0xff]  ;;  %v18_v28 = vld [vmem:[%s587_s0 + $0x20] sm:$0xff] }
   0x8   :  { %v19_v29 = vld [vmem:[%s587_s0 + $0x28] sm:$0xff]  ;;  %v20_v30 = vld [vmem:[%s587_s0 + $0x30] sm:$0xff]  ;;  %v21_v31 = vld [vmem:[%s587_s0 + $0x38] sm:$0xff] }
   0x9   :  { %425 = vmatpush3.bf16.msra.mxu0 %v422_v5  ;;  %v208_v32 = vld [vmem:[%s588_s2] sm:$0xff]  ;;  %v209_v33 = vld [vmem:[%s588_s2 + $0x8] sm:$0xff]  ;;  %v210_v36 = vld [vmem:[%s588_s2 + $0x10] sm:$0xff] }
   0xa   :  { %427 = vmatprep.subr.bf16.mxu0 %v426_v8  ;;  %v451_v34 = vpack.c.bf16 %v209_v33, %v208_v32  ;;  %v211_v37 = vld [vmem:[%s588_s2 + $0x18] sm:$0xff]  ;;  %v212_v39 = vld [vmem:[%s588_s2 + $0x20] sm:$0x1] }
   0xb   :  { %v454_v38 = vpack.c.bf16 %v211_v37, %v210_v36 }
   0xc   :  { %452 = vmatpush3.bf16.msra.mxu1 %v451_v34 }
   0xd   :  { %429 = vmatpush3.bf16.msra.mxu0 %v426_v8  ;;  %453 = vmatprep.subr.bf16.mxu1 %v463_v35 }
   0xe   :  { %431 = vmatprep.subr.bf16.mxu0 %v430_v12 }
  0x10   :  { %455 = vmatpush3.bf16.msra.mxu1 %v454_v38 }
  0x11   :  { %433 = vmatpush3.bf16.msra.mxu0 %v430_v12  ;;  %413 = vmatprep.subr.mxu1 %v464_v40 }
  0x12   :  { %435 = vmatprep.subr.bf16.mxu0 %v434_v15 }
  0x14   :  { %414 = vmatpush3.msk.msra.mxu1 %vm237_vm0, %v212_v39 }
  0x15   :  { %437 = vmatpush3.bf16.msra.mxu0 %v434_v15 }
  0x16   :  { %439 = vmatprep.subr.bf16.mxu0 %v438_v18 }
  0x19   :  { %441 = vmatpush3.bf16.msra.mxu0 %v438_v18 }
  0x1a   :  { %443 = vmatprep.subr.bf16.mxu0 %v442_v21 }
  0x1d   :  { %445 = vmatpush3.bf16.msra.mxu0 %v442_v21 }
  0x1e   :  { %447 = vmatprep.subr.bf16.mxu0 %v446_v24 }
  0x21   :  { %449 = vmatpush3.bf16.msra.mxu0 %v446_v24 }
  0x24   :  { %394 = vmatmul.mubr.f32.vlgmr.msra.gmra.mrb[0].mxu0 %v15_v25 }
  0x25   :  { %396 = vmatprep.mubr.f32.mxu0 %v16_v26 }
  0x28   :  { %397 = vmatmul.mubr.f32.gmra.mrb[2].mxu0 %v17_v27 }
  0x29   :  { %399 = vmatprep.mubr.f32.mxu0 %v18_v28 }
  0x2c   :  { %400 = vmatmul.mubr.f32.gmra.mrb[4].mxu0 %v19_v29 }
  0x2d   :  { %402 = vmatprep.mubr.f32.mxu0 %v20_v30 }
  0x30   :  { %403 = vmatmul.mubr.f32.gmra.mrb[6].mxu0 %v21_v31 }
  0xf7   :  { %v395_v41 = vpop.f32.mrb[0].mxu0 }
  0xf8   :  { %v144_v42 = vmax.f32 %v395_v41, 0.0  ;;  %v104_v43 = vpop.f32.mrb[1].mxu0 }
  0xf9   :  { %v143_v44 = vmax.f32 %v104_v43, 0.0 }
  0xfa   :  { %v159_v45 = vsel %vm151_vm2, %v144_v42, -inf }
  0xfb   :  { %v160_v46 = vrot.slane %v159_v45, 4  ;;  %v152_v47 = vsel %vm151_vm2, %v143_v44, -inf  ;;  %v398_v48 = vpop.f32.mrb[2].mxu0 }
  0xfc   :  { %v153_v49 = vrot.slane %v152_v47, 4  ;;  %v146_v50 = vmax.f32 %v398_v48, 0.0  ;;  %v114_v51 = vpop.f32.mrb[3].mxu0 }
  0xfd   :  { %v161_v52 = vmax.f32 %v159_v45, %v160_v46  ;;  %v145_v53 = vmax.f32 %v114_v51, 0.0 }
  0xfe   :  { %v154_v54 = vmax.f32 %v152_v47, %v153_v49  ;;  %v173_v55 = vsel %vm151_vm2, %v146_v50, -inf }
  0xff   :  { %v162_v56 = vrot.slane %v161_v52, 2  ;;  %v174_v57 = vrot.slane %v173_v55, 4  ;;  %v166_v58 = vsel %vm151_vm2, %v145_v53, -inf  ;;  %v401_v59 = vpop.f32.mrb[4].mxu0 }
 0x100   :  { %v155_v60 = vrot.slane %v154_v54, 2  ;;  %v167_v61 = vrot.slane %v166_v58, 4  ;;  %v148_v62 = vmax.f32 %v401_v59, 0.0  ;;  %v124_v63 = vpop.f32.mrb[5].mxu0 }
 0x101   :  { %v163_v0 = vmax.f32 %v161_v52, %v162_v56  ;;  %v175_v1 = vmax.f32 %v173_v55, %v174_v57  ;;  %v147_v2 = vmax.f32 %v124_v63, 0.0  ;;  %v311_v56 = vlaneseq }
 0x102   :  { %v156_v3 = vmax.f32 %v154_v54, %v155_v60  ;;  %v168_v4 = vmax.f32 %v166_v58, %v167_v61  ;;  %v187_v5 = vsel %vm151_vm2, %v148_v62, -inf }
 0x103   :  { %v164_v6 = vrot.slane %v163_v0, 1  ;;  %v176_v7 = vrot.slane %v175_v1, 2  ;;  %v188_v8 = vrot.slane %v187_v5, 4  ;;  %v180_v9 = vsel %vm151_vm2, %v147_v2, -inf  ;;  %v404_v10 = vpop.f32.mrb[6].mxu0 }
 0x104   :  { %v157_v11 = vrot.slane %v156_v3, 1  ;;  %v169_v12 = vrot.slane %v168_v4, 2  ;;  %v181_v13 = vrot.slane %v180_v9, 4  ;;  %v150_v14 = vmax.f32 %v404_v10, 0.0  ;;  %v134_v15 = vpop.f32.mrb[7].mxu0 }
 0x105   :  { %v165_v16 = vmax.f32 %v163_v0, %v164_v6  ;;  %v177_v17 = vmax.f32 %v175_v1, %v176_v7  ;;  %v189_v18 = vmax.f32 %v187_v5, %v188_v8  ;;  %v149_v19 = vmax.f32 %v134_v15, 0.0 }
 0x106   :  { %v158_v20 = vmax.f32 %v156_v3, %v157_v11  ;;  %v170_v21 = vmax.f32 %v168_v4, %v169_v12  ;;  %v182_v22 = vmax.f32 %v180_v9, %v181_v13  ;;  %v201_v23 = vsel %vm151_vm2, %v150_v14, -inf }
 0x107   :  { %v178_v24 = vrot.slane %v177_v17, 1  ;;  %v190_v25 = vrot.slane %v189_v18, 2  ;;  %v202_v26 = vrot.slane %v201_v23, 4  ;;  %v194_v27 = vsel %vm151_vm2, %v149_v19, -inf }
 0x108   :  { %v222_v28 = vsel %vm221_vm3, %v165_v16, %v158_v20  ;;  %v171_v29 = vrot.slane %v170_v21, 1  ;;  %v183_v30 = vrot.slane %v182_v22, 2  ;;  %v195_v31 = vrot.slane %v194_v27, 4 }
 0x109   :  { %v191_v32 = vmax.f32 %v189_v18, %v190_v25  ;;  %v203_v33 = vmax.f32 %v201_v23, %v202_v26  ;;  %v179_v37 = vmax.f32 %v177_v17, %v178_v24  ;;  %v312_v57 = vand.u32 127, %v311_v56 }
 0x10a   :  { %v172_v34 = vmax.f32 %v170_v21, %v171_v29  ;;  %v184_v35 = vmax.f32 %v182_v22, %v183_v30  ;;  %v196_v36 = vmax.f32 %v194_v27, %v195_v31 }
 0x10b   :  { %v192_v38 = vrot.slane %v191_v32, 1  ;;  %v204_v39 = vrot.slane %v203_v33, 2  ;;  %vm313_vm10 = vcmp.lt.s32.totalorder %v312_v57, 4 }
 0x10c   :  { %v224_v40 = vsel %vm223_vm4, %v172_v34, %v222_v28  ;;  %v185_v41 = vrot.slane %v184_v35, 1  ;;  %v197_v42 = vrot.slane %v196_v36, 2 }
 0x10d   :  { %v205_v43 = vmax.f32 %v203_v33, %v204_v39  ;;  %v226_v44 = vsel %vm225_vm5, %v179_v37, %v224_v40  ;;  %v193_v47 = vmax.f32 %v191_v32, %v192_v38 }
 0x10e   :  { %v186_v45 = vmax.f32 %v184_v35, %v185_v41  ;;  %v198_v46 = vmax.f32 %v196_v36, %v197_v42 }
 0x10f   :  { %v206_v48 = vrot.slane %v205_v43, 1 }
 0x110   :  { %v199_v49 = vrot.slane %v198_v46, 1  ;;  %v228_v50 = vsel %vm227_vm6, %v186_v45, %v226_v44 }
 0x111   :  { %v230_v51 = vsel %vm229_vm7, %v193_v47, %v228_v50  ;;  %v207_v53 = vmax.f32 %v205_v43, %v206_v48 }
 0x112   :  { %v200_v52 = vmax.f32 %v198_v46, %v199_v49 }
 0x114   :  { %v232_v54 = vsel %vm231_vm8, %v200_v52, %v230_v51 }
 0x115   :  { %v234_v55 = vsel %vm233_vm9, %v207_v53, %v232_v54 }
 0x116   :  { %416 = vmatmul.mubr.msk.f32.vlgmr.msra.gmra.mrb[0].mxu1 %vm151_vm2, %v234_v55 }
 0x1e9   :  { %v307_v58 = vpop.f32.mrb[0].mxu1 }
 0x1ea   :  { %v417_v59 = vpop.f32.mrb[1].mxu1  ;;  %v314_v60 = vsel %vm313_vm10, %v307_v58, -1e+30 }
 0x1eb   :  { %315 = vmax.xlane.f32.xlu0 %v314_v60 }
 0x278   :  { %v316_v61 = vpop.xlane.xlu0 %315 }
 0x279   :  { %v317_v62 = vsub.f32 %v314_v60, %v316_v61 }
 0x27b   :  { %v318_v63 = vmul.f32 1.442695, %v317_v62 }
 0x27d   :  { %459 = vpow2.f32 %v318_v63 }
 0x287   :  { %v460_v0 = vpop.eup %459 }
 0x288   :  { %320 = vadd.xlane.f32.xlu0 %v460_v0 }
 0x315   :  { %v321_v1 = vpop.xlane.xlu0 %320 }
 0x316   :  { %461 = vrcp.f32 %v321_v1 }
 0x320   :  { %v462_v2 = vpop.eup %461 }
 0x321   :  { %v323_v3 = vmul.f32 %v462_v2, %v460_v0 }
 0x323   :  { %324 = vst [vmem:[%s589_s3] sm:$0xff] %v323_v3 }

</bundles_post_ra>
